<compile_context>
chip_gen: v7x
topology: tpu7x:2x2x1
jax: 0.10.0
libtpu: 0.0.40
codegen_flags: <defaults>
</compile_context>

<pallas_src>
import math

import jax
import jax.numpy as jnp
from jax.experimental import pallas as pl
from jax.experimental.pallas import tpu as pltpu

# PyTorch RReLU defaults: lower=1/8, upper=1/3; eval uses the mean slope.
RRELU_SLOPE = (1.0 / 8.0 + 1.0 / 3.0) / 2.0
BN_EPS = 1e-5
SUBLANE = 8


def _round_up(x, m):
    return (x + m - 1) // m * m


# ----------------------------------------------------------------------------
# Kernel: one batch tile of the whole MLP (BN already folded into w/b).
# ----------------------------------------------------------------------------
def _edge_predictor_kernel(x_ref, w1_ref, b1_ref, w2_ref, b2_ref,
                           w3_ref, b3_ref, out_ref):
    # Layer 1: (Linear + folded BN) -> RReLU(eval) -> Dropout(eval: identity).
    # bf16 MXU operands, f32 accumulation; activation math stays f32.
    x = x_ref[...].astype(jnp.bfloat16)
    h = jnp.dot(x, w1_ref[...], preferred_element_type=jnp.float32) + b1_ref[...]
    h = jnp.where(h >= 0.0, h, RRELU_SLOPE * h)
    # TODO(synk): training-mode dropout / per-element random RReLU slopes omitted (eval semantics).

    # Layer 2: (Linear + folded BN) -> RReLU(eval) -> Dropout(eval: identity).
    h = jnp.dot(h.astype(jnp.bfloat16), w2_ref[...],
                preferred_element_type=jnp.float32) + b2_ref[...]
    h = jnp.where(h >= 0.0, h, RRELU_SLOPE * h)

    # Output layer: Linear -> numerically stable sigmoid (exp uses the EUP slot).
    logits = jnp.dot(h.astype(jnp.bfloat16), w3_ref[...],
                     preferred_element_type=jnp.float32) + b3_ref[...]
    z = jnp.exp(-jnp.abs(logits))
    inv = 1.0 / (1.0 + z)
    out_ref[...] = jnp.where(logits >= 0.0, inv, z * inv)


# ----------------------------------------------------------------------------
# Wrapper: BN folding, bf16 weight cast, batch-tiled pallas_call (no padding).
# ----------------------------------------------------------------------------
def _fold_bn(w, b, gamma, beta, mean, var):
    """Fold eval-mode BatchNorm1d into the preceding Linear (w is [in, out])."""
    scale = gamma * jax.lax.rsqrt(var + BN_EPS)        # [1, out]
    return w * scale, (b - mean) * scale + beta


def edge_predictor_forward(x, params, *, tile_n=1024):
    """x: [N, embedding_dim] float32 -> [N, num_classes] probabilities."""
    n, e = x.shape
    h_dim = params["w1"].shape[1]
    c = params["w3"].shape[1]

    # Fold eval-mode BatchNorm into the Linear layers and cast weights to bf16
    # once (biases stay f32: they are added after the f32-accumulated matmul).
    w1, b1 = _fold_bn(params["w1"], params["b1"], params["g1"], params["be1"],
                      params["m1"], params["v1"])
    w2, b2 = _fold_bn(params["w2"], params["b2"], params["g2"], params["be2"],
                      params["m2"], params["v2"])
    w3, b3 = params["w3"], params["b3"]
    w1 = w1.astype(jnp.bfloat16)
    w2 = w2.astype(jnp.bfloat16)
    w3 = w3.astype(jnp.bfloat16)

    # Batch tile: multiple of 8 sublanes; shrink so the grid has >= 2 steps
    # whenever possible (engages both v7x TensorCores). Ragged last block is
    # handled by Pallas masking (grid = cdiv(n, tile_n)).
    tile_n = max(SUBLANE, _round_up(min(tile_n, max(1, pl.cdiv(n, 2))), SUBLANE))
    grid = (pl.cdiv(n, tile_n),)

    def resident(shape):
        # Weights / biases: same block every grid step -> stay resident in VMEM.
        return pl.BlockSpec(shape, lambda i: (0, 0))

    # VMEM budget: double-buffered x/out tiles, resident bf16 weights + f32
    # biases, plus headroom for live f32/bf16 intermediates. Capped at 48 MiB
    # to leave headroom under v7x's 64 MiB physical VMEM.
    vmem_bytes = (
        2 * tile_n * e * 4                                  # x tiles (f32, x2 bufs)
        + 2 * tile_n * c * 4                                # out tiles (f32, x2 bufs)
        + 2 * 2 * (e * h_dim + h_dim * h_dim + h_dim * c)   # bf16 weights (x2 bufs)
        + 2 * 4 * (2 * h_dim + c)                           # f32 biases (x2 bufs)
        + 4 * 4 * tile_n * max(h_dim, e)                    # live intermediates
    )
    vmem_limit = int(min(max(2 * vmem_bytes, 8 << 20), 48 << 20))

    cost = pl.CostEstimate(
        flops=2 * n * (e * h_dim + h_dim * h_dim + h_dim * c),
        transcendentals=n * c,
        bytes_accessed=(4 * n * (e + c)
                        + 2 * (e * h_dim + h_dim * h_dim + h_dim * c)
                        + 4 * (2 * h_dim + c)),
    )

    out = pl.pallas_call(
        _edge_predictor_kernel,
        out_shape=jax.ShapeDtypeStruct((n, c), jnp.float32),
        grid=grid,
        in_specs=[
            pl.BlockSpec((tile_n, e), lambda i: (i, 0)),     # x tile (unpadded)
            resident((e, h_dim)), resident((1, h_dim)),      # layer 1
            resident((h_dim, h_dim)), resident((1, h_dim)),  # layer 2
            resident((h_dim, c)), resident((1, c)),          # output layer
        ],
        out_specs=pl.BlockSpec((tile_n, c), lambda i: (i, 0)),
        compiler_params=pltpu.CompilerParams(
            dimension_semantics=("parallel",),
            vmem_limit_bytes=vmem_limit,
        ),
        cost_estimate=cost,
    )(x, w1, b1, w2, b2, w3, b3)

    return out


# ----------------------------------------------------------------------------
# Parameter init matching the PyTorch module (Xavier uniform, zero bias,
# fresh BatchNorm running stats) and pure-JAX references.
# ----------------------------------------------------------------------------
def _xavier_uniform(key, fan_in, fan_out):
    bound = math.sqrt(6.0 / (fan_in + fan_out))
    # PyTorch Linear weight is [out, in]; we store the transpose [in, out].
    return jax.random.uniform(
        key, (fan_in, fan_out), dtype=jnp.float32, minval=-bound, maxval=bound
    )


def init_params(key, embedding_dim, hidden_dim, num_classes):
    k1, k2, k3 = jax.random.split(key, 3)
    row = lambda d, v: jnp.full((1, d), v, dtype=jnp.float32)
    return {
        "w1": _xavier_uniform(k1, embedding_dim, hidden_dim), "b1": row(hidden_dim, 0.0),
        "w2": _xavier_uniform(k2, hidden_dim, hidden_dim),    "b2": row(hidden_dim, 0.0),
        "w3": _xavier_uniform(k3, hidden_dim, num_classes),   "b3": row(num_classes, 0.0),
        "g1": row(hidden_dim, 1.0), "be1": row(hidden_dim, 0.0),
        "m1": row(hidden_dim, 0.0), "v1": row(hidden_dim, 1.0),
        "g2": row(hidden_dim, 1.0), "be2": row(hidden_dim, 0.0),
        "m2": row(hidden_dim, 0.0), "v2": row(hidden_dim, 1.0),
    }


def _reference_f32(x, p):
    """Pure-f32 reference, BatchNorm unfolded (module semantics)."""
    h = x @ p["w1"] + p["b1"]
    h = (h - p["m1"]) * p["g1"] / jnp.sqrt(p["v1"] + BN_EPS) + p["be1"]
    h = jnp.where(h >= 0, h, RRELU_SLOPE * h)
    h = h @ p["w2"] + p["b2"]
    h = (h - p["m2"]) * p["g2"] / jnp.sqrt(p["v2"] + BN_EPS) + p["be2"]
    h = jnp.where(h >= 0, h, RRELU_SLOPE * h)
    return jax.nn.sigmoid(h @ p["w3"] + p["b3"])


def _reference_bf16(x, p):
    """Mirrors the kernel arithmetic: folded BN, bf16 operands, f32 accumulate."""
    w1, b1 = _fold_bn(p["w1"], p["b1"], p["g1"], p["be1"], p["m1"], p["v1"])
    w2, b2 = _fold_bn(p["w2"], p["b2"], p["g2"], p["be2"], p["m2"], p["v2"])
    w3, b3 = p["w3"], p["b3"]
    h = jnp.dot(x.astype(jnp.bfloat16), w1.astype(jnp.bfloat16),
                preferred_element_type=jnp.float32) + b1
    h = jnp.where(h >= 0, h, RRELU_SLOPE * h)
    h = jnp.dot(h.astype(jnp.bfloat16), w2.astype(jnp.bfloat16),
                preferred_element_type=jnp.float32) + b2
    h = jnp.where(h >= 0, h, RRELU_SLOPE * h)
    logits = jnp.dot(h.astype(jnp.bfloat16), w3.astype(jnp.bfloat16),
                     preferred_element_type=jnp.float32) + b3
    return jax.nn.sigmoid(logits)


if __name__ == "__main__":
    batch = 8
    embedding_dim = 16
    hidden_dim = 32
    num_classes = 1

    key = jax.random.PRNGKey(0)
    kx, kp = jax.random.split(key)
    x = jax.random.normal(kx, (batch, embedding_dim), dtype=jnp.float32)
    params = init_params(kp, embedding_dim, hidden_dim, num_classes)

    out = edge_predictor_forward(x, params)
    out = jax.block_until_ready(out)

    assert out.shape == (batch, num_classes)

    ref_mirror = _reference_bf16(x, params)   # same arithmetic as the kernel
    ref_f32 = _reference_f32(x, params)       # module's f32 semantics
    err_mirror = float(jnp.max(jnp.abs(out - ref_mirror)))
    err_f32 = float(jnp.max(jnp.abs(out - ref_f32)))
    assert jnp.allclose(out, ref_mirror, atol=1e-4, rtol=1e-4), err_mirror
    assert jnp.allclose(out, ref_f32, atol=2e-2, rtol=2e-2), err_f32

    print("KERNEL_OK")
</pallas_src>

<mosaic_0001>
module attributes {stable_mosaic.version = 11 : i64} {
  func.func @_edge_predictor_kernel(%arg0: i32, %arg1: memref<8x16xf32, #tpu.memory_space<vmem>>, %arg2: memref<16x32xbf16, #tpu.memory_space<vmem>>, %arg3: memref<1x32xf32, #tpu.memory_space<vmem>>, %arg4: memref<32x32xbf16, #tpu.memory_space<vmem>>, %arg5: memref<1x32xf32, #tpu.memory_space<vmem>>, %arg6: memref<32x1xbf16, #tpu.memory_space<vmem>>, %arg7: memref<1x1xf32, #tpu.memory_space<vmem>>, %arg8: memref<8x1xf32, #tpu.memory_space<vmem>>) attributes {dimension_semantics = [#tpu.dimension_semantics<parallel>], iteration_bounds = array<i64: 1>, scalar_prefetch = 0 : i64, scratch_operands = 0 : i64, tpu.core_type = #tpu.core_type<tc>, window_params = [{transform_indices = @transform_0, window_bounds = array<i64: 8, 16>}, {pipeline_mode = #tpu.pipeline_mode<synchronous>, transform_indices = @transform_1, window_bounds = array<i64: 16, 32>}, {pipeline_mode = #tpu.pipeline_mode<synchronous>, transform_indices = @transform_2, window_bounds = array<i64: 1, 32>}, {pipeline_mode = #tpu.pipeline_mode<synchronous>, transform_indices = @transform_3, window_bounds = array<i64: 32, 32>}, {pipeline_mode = #tpu.pipeline_mode<synchronous>, transform_indices = @transform_4, window_bounds = array<i64: 1, 32>}, {pipeline_mode = #tpu.pipeline_mode<synchronous>, transform_indices = @transform_5, window_bounds = array<i64: 32, 1>}, {pipeline_mode = #tpu.pipeline_mode<synchronous>, transform_indices = @transform_6, window_bounds = array<i64: 1, 1>}, {transform_indices = @transform_7, window_bounds = array<i64: 8, 1>}]} {
    %c0 = arith.constant 0 : index
    %c0_0 = arith.constant 0 : index
    %0 = vector.load %arg1[%c0, %c0_0] : memref<8x16xf32, #tpu.memory_space<vmem>>, vector<8x16xf32>
    %1 = arith.truncf %0 : vector<8x16xf32> to vector<8x16xbf16>
    %c0_1 = arith.constant 0 : index
    %c0_2 = arith.constant 0 : index
    %2 = vector.load %arg2[%c0_1, %c0_2] : memref<16x32xbf16, #tpu.memory_space<vmem>>, vector<16x32xbf16>
    %cst = arith.constant dense<0.000000e+00> : vector<8x32xf32>
    %3 = tpu.matmul %1, %2, %cst {dimension_numbers = #tpu.dot_dimension_numbers<[1], [0], [0], [1], [0, 0, 1, 1], [], []>} : vector<8x16xbf16>, vector<16x32xbf16>, vector<8x32xf32> -> vector<8x32xf32>
    %c0_3 = arith.constant 0 : index
    %c0_4 = arith.constant 0 : index
    %4 = vector.load %arg3[%c0_3, %c0_4] : memref<1x32xf32, #tpu.memory_space<vmem>>, vector<1x32xf32>
    %5 = vector.broadcast %4 : vector<1x32xf32> to vector<8x32xf32>
    %6 = arith.addf %3, %5 : vector<8x32xf32>
    %cst_5 = arith.constant 0.000000e+00 : f32
    %7 = vector.broadcast %cst_5 : f32 to vector<8x32xf32>
    %8 = arith.cmpf oge, %6, %7 : vector<8x32xf32>
    %cst_6 = arith.constant 0.229166672 : f32
    %9 = vector.broadcast %cst_6 : f32 to vector<8x32xf32>
    %10 = arith.mulf %9, %6 : vector<8x32xf32>
    %11 = arith.select %8, %6, %10 : vector<8x32xi1>, vector<8x32xf32>
    %12 = arith.truncf %11 : vector<8x32xf32> to vector<8x32xbf16>
    %c0_7 = arith.constant 0 : index
    %c0_8 = arith.constant 0 : index
    %13 = vector.load %arg4[%c0_7, %c0_8] : memref<32x32xbf16, #tpu.memory_space<vmem>>, vector<32x32xbf16>
    %cst_9 = arith.constant dense<0.000000e+00> : vector<8x32xf32>
    %14 = tpu.matmul %12, %13, %cst_9 {dimension_numbers = #tpu.dot_dimension_numbers<[1], [0], [0], [1], [0, 0, 1, 1], [], []>} : vector<8x32xbf16>, vector<32x32xbf16>, vector<8x32xf32> -> vector<8x32xf32>
    %c0_10 = arith.constant 0 : index
    %c0_11 = arith.constant 0 : index
    %15 = vector.load %arg5[%c0_10, %c0_11] : memref<1x32xf32, #tpu.memory_space<vmem>>, vector<1x32xf32>
    %16 = vector.broadcast %15 : vector<1x32xf32> to vector<8x32xf32>
    %17 = arith.addf %14, %16 : vector<8x32xf32>
    %cst_12 = arith.constant 0.000000e+00 : f32
    %18 = vector.broadcast %cst_12 : f32 to vector<8x32xf32>
    %19 = arith.cmpf oge, %17, %18 : vector<8x32xf32>
    %cst_13 = arith.constant 0.229166672 : f32
    %20 = vector.broadcast %cst_13 : f32 to vector<8x32xf32>
    %21 = arith.mulf %20, %17 : vector<8x32xf32>
    %22 = arith.select %19, %17, %21 : vector<8x32xi1>, vector<8x32xf32>
    %23 = arith.truncf %22 : vector<8x32xf32> to vector<8x32xbf16>
    %c0_14 = arith.constant 0 : index
    %c0_15 = arith.constant 0 : index
    %24 = vector.load %arg6[%c0_14, %c0_15] : memref<32x1xbf16, #tpu.memory_space<vmem>>, vector<32x1xbf16>
    %cst_16 = arith.constant dense<0.000000e+00> : vector<8x1xf32>
    %25 = tpu.matmul %23, %24, %cst_16 {dimension_numbers = #tpu.dot_dimension_numbers<[1], [0], [0], [1], [0, 0, 1, 1], [], []>} : vector<8x32xbf16>, vector<32x1xbf16>, vector<8x1xf32> -> vector<8x1xf32>
    %c0_17 = arith.constant 0 : index
    %c0_18 = arith.constant 0 : index
    %26 = vector.load %arg7[%c0_17, %c0_18] : memref<1x1xf32, #tpu.memory_space<vmem>>, vector<1x1xf32>
    %27 = vector.broadcast %26 : vector<1x1xf32> to vector<8x1xf32>
    %28 = arith.addf %25, %27 : vector<8x1xf32>
    %29 = math.absf %28 : vector<8x1xf32>
    %cst_19 = arith.constant 0.000000e+00 : f32
    %30 = vector.broadcast %cst_19 : f32 to vector<8x1xf32>
    %31 = arith.subf %30, %29 : vector<8x1xf32>
    %32 = math.exp %31 : vector<8x1xf32>
    %cst_20 = arith.constant 1.000000e+00 : f32
    %33 = vector.broadcast %cst_20 : f32 to vector<8x1xf32>
    %34 = arith.addf %33, %32 : vector<8x1xf32>
    %cst_21 = arith.constant 1.000000e+00 : f32
    %35 = vector.broadcast %cst_21 : f32 to vector<8x1xf32>
    %36 = arith.divf %35, %34 : vector<8x1xf32>
    %cst_22 = arith.constant 0.000000e+00 : f32
    %37 = vector.broadcast %cst_22 : f32 to vector<8x1xf32>
    %38 = arith.cmpf oge, %28, %37 : vector<8x1xf32>
    %39 = arith.mulf %32, %36 : vector<8x1xf32>
    %40 = arith.select %38, %36, %39 : vector<8x1xi1>, vector<8x1xf32>
    %c0_23 = arith.constant 0 : index
    %c0_24 = arith.constant 0 : index
    %41 = vector.load %arg8[%c0_23, %c0_24] : memref<8x1xf32, #tpu.memory_space<vmem>>, vector<8x1xf32>
    tpu.vector_store %arg8[%c0_23, %c0_24], %40 {strides = array<i32>} : memref<8x1xf32, #tpu.memory_space<vmem>>, vector<8x1xf32>,
    return
  }
  func.func @transform_0(%arg0: i32) -> (i32, i32) {
    %c0_i32 = arith.constant 0 : i32
    %c0_i32_0 = arith.constant 0 : i32
    return %arg0, %c0_i32 : i32, i32
  }
  func.func @transform_1(%arg0: i32) -> (i32, i32) {
    %c0_i32 = arith.constant 0 : i32
    %c0_i32_0 = arith.constant 0 : i32
    %c0_i32_1 = arith.constant 0 : i32
    return %c0_i32, %c0_i32_0 : i32, i32
  }
  func.func @transform_2(%arg0: i32) -> (i32, i32) {
    %c0_i32 = arith.constant 0 : i32
    %c0_i32_0 = arith.constant 0 : i32
    %c0_i32_1 = arith.constant 0 : i32
    return %c0_i32, %c0_i32_0 : i32, i32
  }
  func.func @transform_3(%arg0: i32) -> (i32, i32) {
    %c0_i32 = arith.constant 0 : i32
    %c0_i32_0 = arith.constant 0 : i32
    %c0_i32_1 = arith.constant 0 : i32
    return %c0_i32, %c0_i32_0 : i32, i32
  }
  func.func @transform_4(%arg0: i32) -> (i32, i32) {
    %c0_i32 = arith.constant 0 : i32
    %c0_i32_0 = arith.constant 0 : i32
    %c0_i32_1 = arith.constant 0 : i32
    return %c0_i32, %c0_i32_0 : i32, i32
  }
  func.func @transform_5(%arg0: i32) -> (i32, i32) {
    %c0_i32 = arith.constant 0 : i32
    %c0_i32_0 = arith.constant 0 : i32
    %c0_i32_1 = arith.constant 0 : i32
    return %c0_i32, %c0_i32_0 : i32, i32
  }
  func.func @transform_6(%arg0: i32) -> (i32, i32) {
    %c0_i32 = arith.constant 0 : i32
    %c0_i32_0 = arith.constant 0 : i32
    %c0_i32_1 = arith.constant 0 : i32
    return %c0_i32, %c0_i32_0 : i32, i32
  }
  func.func @transform_7(%arg0: i32) -> (i32, i32) {
    %c0_i32 = arith.constant 0 : i32
    %c0_i32_0 = arith.constant 0 : i32
    return %arg0, %c0_i32 : i32, i32
  }
}

</mosaic_0001>

<bundles_post_ra>
// kernel: tpu_custom_call.1
= control target key start
LH: loop header
LB: loop body
LE: loop exit
PB: predicated region body
PF: predicated region fallthrough
CT: control target
= control target key end

     0   :  { %s421_s0 = inlined_call_operand.vmem [shape: f32[8,16], index: 0, kind: input, shape index: {}]   ;;  %s422_s1 = inlined_call_operand.vmem [shape: bf16[16,32], index: 1, kind: input, shape index: {}]   ;;  %s423_s2 = inlined_call_operand.hbm [shape: f32[1,32], index: 2, kind: input, shape index: {}]   ;;  %s424_s3 = inlined_call_operand.vmem [shape: bf16[32,32], index: 3, kind: input, shape index: {}]   ;;  %s425_s4 = inlined_call_operand.vmem [shape: f32[1,32], index: 4, kind: input, shape index: {}]   ;;  %s426_s5 = inlined_call_operand.vmem [shape: bf16[32,1], index: 5, kind: input, shape index: {}]   ;;  %s427_s6 = inlined_call_operand.<no memory space> [shape: f32[1,1], index: 6, kind: input, shape index: {}]   ;;  %s428_s7 = inlined_call_operand.vmem [shape: f32[8,1], index: 7, kind: output, shape index: {}]  }
   0x1   :  { %v12_v0 = vstv %s427_s6 }
   0x2   :  { %13 = vst [vmem:[#allocation2] sm:$0x1] %v12_v0 }
   0x3   :  { %14 = vsyncpa [#allocation4], 0  ;;  %s337_s26 = smov [#allocation3]   ;;  %s313_s30 = scalar_lea.hbm %s423_s2, 16 }
   0x4   :  { %s25_s27 = sshll.u32 %s337_s26, 4  ;;  %p314_p0 = scmp.ne.s32.totalorder %s423_s2, %s313_s30  ;;  %s26_s27 = int_to_ptr.vmem [resolvable:$true] %s25_s27 }
   0x5   :  { %p317_p1 = scmp.lt.u32.totalorder %s313_s30, %s423_s2 }
   0x7   :  { %p319_p2 = pnand %p317_p1, %p314_p0 }
   0x9   :  { %322 = shalt.err (!%p319_p2)
}
   0xa   :  { %s323_s6 = scalar_lea.vmem %s26_s27, 16  ;;  %s327_s12 = scalar_lea.vmem %s26_s27, 32 }
   0xb   :  { %p324_p3 = scmp.ne.s32.totalorder %s26_s27, %s323_s6  ;;  %p328_p4 = scmp.lt.s32.totalorder %s26_s27, %s26_s27 }
   0xc   :  { %p329_p5 = scmp.lt.s32.totalorder %s327_s12, %s323_s6 }
   0xe   :  { %p330_p6 = por %p329_p5, %p328_p4 }
  0x10   :  { %p331_p7 = pnand %p330_p6, %p324_p3 }
  0x12   :  { %334 = shalt.err (!%p331_p7)
}
  0x13   :  { %28 = dma.hbm_to_vmem [thread:$0]  %s423_s2, 16, %s26_s27, [#allocation4]  }
  0x14   :  { %335 = dma.done.wait [#allocation4], 16  }
  0x15   :  { %336 = vsyncadd [#allocation4], 4294967280  ;;  %v338_v1 = vmov 0.0   ;;  %vm339_vm0 = vmmov 0   ;;  %v304_v2 = vld [vmem:[%s422_s1] sm:$0xff]   ;;  %vm58_vm1 = vcmask 130048  }
  0x16   :  { %279 = vmatprep.subr.bf16.mxu0 %v338_v1  ;;  %281 = vmatprep.mubr.msk.bf16.mxu0 %vm339_vm0, %v338_v1  ;;  %v41_v3 = vld [vmem:[%s421_s0] sm:$0xff]  ;;  %v306_v6 = vld [vmem:[%s424_s3 + $0x8] sm:$0xff]   ;;  %vm129_vm3 = vcmask 261120   ;;  %vm253_vm5 = vcmask 7168  }
  0x17   :  { %285 = vmatprep.subr.bf16.mxu1 %v338_v1  ;;  %289 = vmatprep.mubr.msk.bf16.mxu1 %vm339_vm0, %v338_v1  ;;  %v42_v4 = vpack.c.bf16 %v41_v3, %v41_v3  ;;  %v305_v5 = vld [vmem:[%s424_s3] sm:$0xff]   ;;  %v308_v17 = vld [vmem:[%s426_s5 + $0x8] sm:$0xff]  }
  0x18   :  { %280 = vmatpush3.bf16.msra.mxu0 %v304_v2  ;;  %286 = vmatpush3.bf16.msra.mxu1 %v305_v5  ;;  %v260_v7 = vld [vmem:[#allocation3] ss:$0 sm:$0xff]  ;;  %v263_v18 = vld [vmem:[%s425_s4] ss:$0 sm:$0xff] }
  0x19   :  { %293 = vmatprep.subr.bf16.mxu0 %v338_v1  ;;  %287 = vmatprep.subr.bf16.mxu1 %v338_v1  ;;  %v307_v16 = vld [vmem:[%s426_s5] sm:$0xff]  }
  0x1a   :  { %v267_v27 = vld [vmem:[#allocation2] ss:$0 sm:$0xff] }
  0x1b   :  { %282 = vmatmul.mubr.msk.bf16.vlgmr.msra.gmra.mrb[0].mxu0 %vm58_vm1, %v42_v4 }
  0x1c   :  { %297 = vmatprep.mubr.msk.bf16.mxu0 %vm339_vm0, %v338_v1  ;;  %288 = vmatpush3.bf16.msra.mxu1 %v306_v6 }
  0x1d   :  { %294 = vmatpush3.bf16.msra.mxu0 %v307_v16 }
  0x1e   :  { %295 = vmatprep.subr.bf16.mxu0 %v338_v1 }
  0x21   :  { %296 = vmatpush3.bf16.msra.mxu0 %v308_v17 }
  0xee   :  { %v96_v8 = vpop.f32.mrb[0].mxu0 }
  0xef   :  { %v97_v9 = vadd.f32 %v260_v7, %v96_v8  ;;  %v283_v10 = vpop.f32.mrb[1].mxu0 }
  0xf0   :  { %v99_v11 = vpop.f32.mrb[2].mxu0 }
  0xf1   :  { %vm102_vm2 = vcmp.ge.f32.partialorder %v97_v9, 0.0  ;;  %v103_v12 = vmul.f32 0.22916667, %v97_v9  ;;  %v284_v13 = vpop.f32.mrb[3].mxu0 }
  0xf3   :  { %v104_v14 = vsel %vm102_vm2, %v97_v9, %v103_v12 }
  0xf4   :  { %v105_v15 = vpack.c.bf16 %v104_v14, %v104_v14 }
  0xf6   :  { %290 = vmatmul.mubr.msk.bf16.vlgmr.msra.gmra.mrb[0].mxu1 %vm129_vm3, %v105_v15 }
 0x1c9   :  { %v167_v19 = vpop.f32.mrb[0].mxu1 }
 0x1ca   :  { %v168_v20 = vadd.f32 %v263_v18, %v167_v19  ;;  %v291_v21 = vpop.f32.mrb[1].mxu1 }
 0x1cb   :  { %v170_v22 = vpop.f32.mrb[2].mxu1 }
 0x1cc   :  { %vm173_vm4 = vcmp.ge.f32.partialorder %v168_v20, 0.0  ;;  %v174_v23 = vmul.f32 0.22916667, %v168_v20  ;;  %v292_v24 = vpop.f32.mrb[3].mxu1 }
 0x1ce   :  { %v175_v25 = vsel %vm173_vm4, %v168_v20, %v174_v23 }
 0x1cf   :  { %v176_v26 = vpack.c.bf16 %v175_v25, %v175_v25 }
 0x1d1   :  { %298 = vmatmul.mubr.msk.bf16.vlgmr.msra.gmra.mrb[4].mxu0 %vm129_vm3, %v176_v26 }
 0x2a4   :  { %v237_v28 = vpop.f32.mrb[4].mxu0 }
 0x2a5   :  { %v238_v29 = vadd.f32 %v267_v27, %v237_v28  ;;  %v299_v30 = vpop.f32.mrb[5].mxu0 }
 0x2a6   :  { %v240_v31 = vpop.f32.mrb[6].mxu0 }
 0x2a7   :  { %v243_v32 = vand.u32 2147483647, %v238_v29  ;;  %v300_v33 = vpop.f32.mrb[7].mxu0  ;;  %vm250_vm6 = vcmp.ge.f32.partialorder %v238_v29, 0.0 }
 0x2a9   :  { %v244_v34 = vsub.f32 0.0, %v243_v32 }
 0x2ab   :  { %v245_v35 = vmul.f32 1.442695, %v244_v34 }
 0x2ad   :  { %309 = vpow2.f32 %v245_v35 }
 0x2b7   :  { %v310_v36 = vpop.eup %309 }
 0x2b8   :  { %v247_v37 = vadd.f32 1.0, %v310_v36 }
 0x2ba   :  { %311 = vrcp.f32 %v247_v37 }
 0x2c4   :  { %v312_v38 = vpop.eup %311 }
 0x2c5   :  { %v251_v39 = vmul.f32 %v312_v38, %v310_v36 }
 0x2c7   :  { %v252_v40 = vsel %vm250_vm6, %v312_v38, %v251_v39 }
 0x2c8   :  { %254 = vst.msk [vmem:[%s428_s7] sm:$0xff] %vm253_vm5, %v252_v40 }
 0x2c9   :  { %259 = vsyncpa [#allocation4], 1 }

</bundles_post_ra>
